<compile_context>
chip_gen: v6e
topology: v6e:2x2x1
jax: 0.10.0
libtpu: 0.0.40
codegen_flags: <defaults>
</compile_context>

<pallas_src>
import functools

import jax
import jax.numpy as jnp
from jax import lax
from jax.experimental import pallas as pl
from jax.experimental.pallas import tpu as pltpu

LANE = 128


def _round_up(x, m):
    return (x + m - 1) // m * m


def _vmem_capacity_bytes():
    try:
        return int(pltpu.get_tpu_info().vmem_capacity_bytes)
    except Exception:
        return 64 * 1024 * 1024  # conservative fallback: v7x per-TensorCore VMEM


# ---------------------------------------------------------------------------
# Kernel: (optional LayerNorm) -> [Linear (-> +bias) -> L2-normalize] * L
# ---------------------------------------------------------------------------
def _mlp_fused_kernel(*refs, num_layers, has_bias, fuse_layernorm, ln_eps,
                      compute_dtype):
    # refs: x_ref, w_0..w_{L-1}, [b_j for layers with bias], o_ref
    x_ref = refs[0]
    w_refs = refs[1:1 + num_layers]
    n_bias = sum(has_bias)
    b_refs = refs[1 + num_layers:1 + num_layers + n_bias]
    o_ref = refs[1 + num_layers + n_bias]

    if fuse_layernorm:
        # nn.LayerNorm(IN, elementwise_affine=False): per-row, biased variance,
        # computed in f32 for exact statistics.
        xf = x_ref[...].astype(jnp.float32)
        mean = jnp.mean(xf, axis=-1, keepdims=True)
        centered = xf - mean
        var = jnp.mean(centered * centered, axis=-1, keepdims=True)
        h = (centered * lax.rsqrt(var + ln_eps)).astype(compute_dtype)
    else:
        h = x_ref[...].astype(compute_dtype)

    bi = 0
    for i in range(num_layers):
        # Linear: bf16 x bf16 on the MXU, f32 accumulate.  Zero-padded weight
        # columns keep the padded output lanes exactly zero.
        y = jnp.dot(h, w_refs[i][...], preferred_element_type=jnp.float32)
        if has_bias[i]:
            y = y + b_refs[bi][...]
            bi += 1
        # F.normalize(y, p=2, dim=1) == y * rsqrt(max(sum(y^2), 1e-24))
        sq = jnp.sum(y * y, axis=-1, keepdims=True)
        y = y * lax.rsqrt(jnp.maximum(sq, 1e-24))
        h = y if i == num_layers - 1 else y.astype(compute_dtype)

    o_ref[...] = h.astype(o_ref.dtype)


# ---------------------------------------------------------------------------
# pallas_call builder (fused over `num_layers` FC layers)
# ---------------------------------------------------------------------------
def _mlp_pallas_call(x, weights, biases, *, fuse_layernorm, ln_eps,
                     compute_dtype, out_dtype):
    B, IN0 = x.shape
    num_layers = len(weights)
    has_bias = tuple(b is not None for b in biases)
    bias_args = [b for b in biases if b is not None]
    OUT_PAD = weights[-1].shape[1]

    # --- VMEM accounting: charge 2 buffers per pipelined operand (Pallas
    #     double-buffers even constant-index operands) + f32 headroom. ---
    w_bytes = sum(int(w.size) * w.dtype.itemsize for w in weights)
    b_bytes = sum(int(b.size) * b.dtype.itemsize for b in bias_args)
    x_isz = jnp.dtype(x.dtype).itemsize
    o_isz = jnp.dtype(out_dtype).itemsize
    widest = max([IN0] + [int(w.shape[1]) for w in weights])

    def working_set(tb):
        return (2 * (w_bytes + b_bytes)          # pinned weights/biases, 2 bufs each
                + 2 * tb * IN0 * x_isz           # double-buffered x tiles
                + 2 * tb * OUT_PAD * o_isz       # double-buffered output tiles
                + 4 * tb * widest * 4)           # f32 intermediates / spill headroom

    vmem_cap = _vmem_capacity_bytes()
    budget = int(vmem_cap * 0.7)                 # leave room for Mosaic scratch

    # Generation-aware tile ceiling: 128 MiB parts (v5e/v6e) afford bigger
    # batch tiles than v7x's 64 MiB-per-TensorCore VMEM.
    tb_cap = 2048 if vmem_cap >= (96 << 20) else 1024

    tb = min(tb_cap, _round_up(B, 8))
    while tb > 8 and working_set(tb) > budget:
        tb = _round_up(tb // 2, 8)
    # v7x megacore: keep >= 2 grid steps so ("parallel",) can split the batch
    # across both TensorCores (harmless on single-TC v5e/v6e).
    if B >= 16:
        tb = min(tb, _round_up(pl.cdiv(B, 2), 8))
    TB = max(tb, 8)

    if working_set(TB) > budget:
        return None                              # caller falls back per-layer

    grid = (pl.cdiv(B, TB),)
    vmem_limit = int(min(vmem_cap - (4 << 20),
                         max(32 << 20, working_set(TB) + (16 << 20))))

    kernel = functools.partial(
        _mlp_fused_kernel, num_layers=num_layers, has_bias=has_bias,
        fuse_layernorm=fuse_layernorm, ln_eps=ln_eps,
        compute_dtype=compute_dtype)

    in_specs = (
        [pl.BlockSpec((TB, IN0), lambda i: (i, 0))]                       # batch-tiled x
        + [pl.BlockSpec(tuple(w.shape), lambda i: (0, 0)) for w in weights]   # pinned W
        + [pl.BlockSpec(tuple(b.shape), lambda i: (0, 0)) for b in bias_args])  # pinned b

    flops = 2 * B * sum(int(w.shape[0]) * int(w.shape[1]) for w in weights)
    bytes_accessed = int(x.size) * x_isz + w_bytes + b_bytes + B * OUT_PAD * o_isz
    transcendentals = B * (num_layers + int(fuse_layernorm))              # rsqrt per row

    return pl.pallas_call(
        kernel,
        out_shape=jax.ShapeDtypeStruct((B, OUT_PAD), out_dtype),
        grid_spec=pltpu.PrefetchScalarGridSpec(
            num_scalar_prefetch=0,
            grid=grid,
            in_specs=in_specs,
            out_specs=pl.BlockSpec((TB, OUT_PAD), lambda i: (i, 0)),
        ),
        compiler_params=pltpu.CompilerParams(
            dimension_semantics=("parallel",),       # megacore sharding on v7x
            vmem_limit_bytes=vmem_limit,
        ),
        cost_estimate=pl.CostEstimate(flops=flops,
                                      transcendentals=transcendentals,
                                      bytes_accessed=bytes_accessed),
    )(x, *weights, *bias_args)


# ---------------------------------------------------------------------------
# Parameter prep (done ONCE at init) + module-level wrapper
# ---------------------------------------------------------------------------
def init_mlp_params(weights, biases=None, *, compute_dtype=jnp.bfloat16):
    """One-time prep: transpose [OUT, IN] -> [IN, OUT], zero-pad feature dims
    to 128-lane multiples, cast weights to bf16.  `weights` are PyTorch-layout
    nn.Linear.weight arrays (float32)."""
    num_layers = len(weights)
    biases = [None] * num_layers if biases is None else list(biases)
    prep_w, prep_b, out_features = [], [], []
    for i, (w, b) in enumerate(zip(weights, biases)):
        out_f, in_f = w.shape
        # Layer 0 keeps its true input width (LayerNorm stats need it); for
        # later layers the padded rows line up with the previous layer's
        # (exactly zero) padded output columns.
        in_pad = in_f if i == 0 else _round_up(in_f, LANE)
        out_pad = _round_up(out_f, LANE)
        w_p = jnp.zeros((in_pad, out_pad), compute_dtype)
        w_p = w_p.at[:in_f, :out_f].set(w.T.astype(compute_dtype))
        prep_w.append(w_p)
        if b is None:
            prep_b.append(None)
        else:
            b_p = jnp.zeros((1, out_pad), jnp.float32)
            prep_b.append(b_p.at[0, :out_f].set(b.astype(jnp.float32)))
        out_features.append(out_f)
    return {"weights": prep_w, "biases": prep_b, "out_features": out_features}


def mlp_layer(x, params, *, standardize_input=True, ln_eps=1e-5,
              compute_dtype=jnp.bfloat16, out_dtype=jnp.float32):
    """MLPLayer.forward (default config): LayerNorm -> [Linear -> L2norm]*N."""
    weights, biases = params["weights"], params["biases"]
    out_features = params["out_features"]
    num_layers = len(weights)

    out = _mlp_pallas_call(x, weights, biases, fuse_layernorm=standardize_input,
                           ln_eps=ln_eps, compute_dtype=compute_dtype,
                           out_dtype=out_dtype)
    if out is None:
        # Pinned weights overflow the VMEM budget: fall back to one fused call
        # per layer (intermediates stay bf16 + lane-padded between calls).
        # TODO(synk): replace with a K-split ("arbitrary" axis over IN + f32
        # VMEM accumulator) so huge weights stream instead of shrinking tiles.
        h = x
        for i in range(num_layers):
            last = i == num_layers - 1
            h = _mlp_pallas_call(
                h, [weights[i]], [biases[i]],
                fuse_layernorm=(standardize_input and i == 0),
                ln_eps=ln_eps, compute_dtype=compute_dtype,
                out_dtype=out_dtype if last else compute_dtype)
            assert h is not None, "single FC layer exceeds VMEM budget (needs K-split)"
        out = h

    # Strip the lane padding added at init time.
    return out[:, :out_features[-1]]


# ---------------------------------------------------------------------------
# Demo / correctness check
# ---------------------------------------------------------------------------
if __name__ == "__main__":
    batch = 16
    feature_sizes = [32, 64, 32]        # MLPLayer(output_feature_sizes=[32, 64, 32])
    nrof_layers = len(feature_sizes) - 1

    key = jax.random.PRNGKey(0)
    keys = jax.random.split(key, 1 + nrof_layers)
    x = jax.random.normal(keys[0], (batch, feature_sizes[0]), jnp.float32)

    # nn.Linear default init: U(-1/sqrt(in), 1/sqrt(in)), layout [out, in].
    # Biases default to False in MLPLayer.
    weights = []
    for i in range(nrof_layers):
        fan_in, fan_out = feature_sizes[i], feature_sizes[i + 1]
        bound = 1.0 / (fan_in ** 0.5)
        weights.append(jax.random.uniform(keys[1 + i], (fan_out, fan_in),
                                          jnp.float32, -bound, bound))

    params = init_mlp_params(weights)   # one-time transpose / pad / bf16 cast
    out = jax.block_until_ready(mlp_layer(x, params))
    assert out.shape == (batch, feature_sizes[-1]), out.shape

    # Pure-JAX f32 reference of MLPLayer.forward (default config).
    def reference(x, weights):
        mean = jnp.mean(x, axis=-1, keepdims=True)
        var = jnp.mean((x - mean) ** 2, axis=-1, keepdims=True)
        h = (x - mean) / jnp.sqrt(var + 1e-5)
        for w in weights:
            y = h @ w.T
            h = y / jnp.maximum(jnp.linalg.norm(y, axis=1, keepdims=True), 1e-12)
        return h

    ref = reference(x, weights)
    max_err = float(jnp.max(jnp.abs(out - ref)))
    # f32 LayerNorm + bf16 weights/intermediates with f32 accumulate; outputs
    # are L2-normalized (<= 1), so 2e-2 abs tolerance is loose for bf16 rounding.
    assert max_err < 2e-2, f"max abs error {max_err}"

    print("KERNEL_OK")
</pallas_src>

<mosaic_0001>
module attributes {stable_mosaic.version = 11 : i64} {
  func.func @_mlp_fused_kernel(%arg0: i32, %arg1: memref<8x32xf32, #tpu.memory_space<vmem>>, %arg2: memref<32x128xbf16, #tpu.memory_space<vmem>>, %arg3: memref<128x128xbf16, #tpu.memory_space<vmem>>, %arg4: memref<8x128xf32, #tpu.memory_space<vmem>>) attributes {dimension_semantics = [#tpu.dimension_semantics<parallel>], iteration_bounds = array<i64: 2>, scalar_prefetch = 0 : i64, scratch_operands = 0 : i64, tpu.core_type = #tpu.core_type<tc>, window_params = [{transform_indices = @transform_0, window_bounds = array<i64: 8, 32>}, {pipeline_mode = #tpu.pipeline_mode<synchronous>, transform_indices = @transform_1, window_bounds = array<i64: 32, 128>}, {pipeline_mode = #tpu.pipeline_mode<synchronous>, transform_indices = @transform_2, window_bounds = array<i64: 128, 128>}, {transform_indices = @transform_3, window_bounds = array<i64: 8, 128>}]} {
    %c0 = arith.constant 0 : index
    %c0_0 = arith.constant 0 : index
    %0 = vector.load %arg1[%c0, %c0_0] : memref<8x32xf32, #tpu.memory_space<vmem>>, vector<8x32xf32>
    %cst = arith.constant dense<0.000000e+00> : vector<8xf32>
    %1 = vector.multi_reduction <add>, %0, %cst [1] : vector<8x32xf32> to vector<8xf32>
    %2 = vector.shape_cast %1 : vector<8xf32> to vector<8x1xf32>
    %cst_1 = arith.constant 3.200000e+01 : f32
    %3 = vector.broadcast %cst_1 : f32 to vector<8x1xf32>
    %4 = arith.divf %2, %3 : vector<8x1xf32>
    %5 = vector.broadcast %4 : vector<8x1xf32> to vector<8x32xf32>
    %6 = arith.subf %0, %5 : vector<8x32xf32>
    %7 = arith.mulf %6, %6 : vector<8x32xf32>
    %cst_2 = arith.constant dense<0.000000e+00> : vector<8xf32>
    %8 = vector.multi_reduction <add>, %7, %cst_2 [1] : vector<8x32xf32> to vector<8xf32>
    %9 = vector.shape_cast %8 : vector<8xf32> to vector<8x1xf32>
    %cst_3 = arith.constant 3.200000e+01 : f32
    %10 = vector.broadcast %cst_3 : f32 to vector<8x1xf32>
    %11 = arith.divf %9, %10 : vector<8x1xf32>
    %cst_4 = arith.constant 9.99999974E-6 : f32
    %12 = vector.broadcast %cst_4 : f32 to vector<8x1xf32>
    %13 = arith.addf %11, %12 : vector<8x1xf32>
    %14 = math.rsqrt %13 : vector<8x1xf32>
    %15 = vector.broadcast %14 : vector<8x1xf32> to vector<8x32xf32>
    %16 = arith.mulf %6, %15 : vector<8x32xf32>
    %17 = arith.truncf %16 : vector<8x32xf32> to vector<8x32xbf16>
    %c0_5 = arith.constant 0 : index
    %c0_6 = arith.constant 0 : index
    %18 = vector.load %arg2[%c0_5, %c0_6] : memref<32x128xbf16, #tpu.memory_space<vmem>>, vector<32x128xbf16>
    %cst_7 = arith.constant dense<0.000000e+00> : vector<8x128xf32>
    %19 = tpu.matmul %17, %18, %cst_7 {dimension_numbers = #tpu.dot_dimension_numbers<[1], [0], [0], [1], [0, 0, 1, 1], [], []>} : vector<8x32xbf16>, vector<32x128xbf16>, vector<8x128xf32> -> vector<8x128xf32>
    %20 = arith.mulf %19, %19 : vector<8x128xf32>
    %cst_8 = arith.constant dense<0.000000e+00> : vector<8xf32>
    %21 = vector.multi_reduction <add>, %20, %cst_8 [1] : vector<8x128xf32> to vector<8xf32>
    %22 = vector.shape_cast %21 : vector<8xf32> to vector<8x1xf32>
    %cst_9 = arith.constant 1.000000e-24 : f32
    %23 = vector.broadcast %cst_9 : f32 to vector<8x1xf32>
    %24 = arith.maximumf %22, %23 : vector<8x1xf32>
    %25 = math.rsqrt %24 : vector<8x1xf32>
    %26 = vector.broadcast %25 : vector<8x1xf32> to vector<8x128xf32>
    %27 = arith.mulf %19, %26 : vector<8x128xf32>
    %28 = arith.truncf %27 : vector<8x128xf32> to vector<8x128xbf16>
    %c0_10 = arith.constant 0 : index
    %c0_11 = arith.constant 0 : index
    %29 = vector.load %arg3[%c0_10, %c0_11] : memref<128x128xbf16, #tpu.memory_space<vmem>>, vector<128x128xbf16>
    %cst_12 = arith.constant dense<0.000000e+00> : vector<8x128xf32>
    %30 = tpu.matmul %28, %29, %cst_12 {dimension_numbers = #tpu.dot_dimension_numbers<[1], [0], [0], [1], [0, 0, 1, 1], [], []>} : vector<8x128xbf16>, vector<128x128xbf16>, vector<8x128xf32> -> vector<8x128xf32>
    %31 = arith.mulf %30, %30 : vector<8x128xf32>
    %cst_13 = arith.constant dense<0.000000e+00> : vector<8xf32>
    %32 = vector.multi_reduction <add>, %31, %cst_13 [1] : vector<8x128xf32> to vector<8xf32>
    %33 = vector.shape_cast %32 : vector<8xf32> to vector<8x1xf32>
    %cst_14 = arith.constant 1.000000e-24 : f32
    %34 = vector.broadcast %cst_14 : f32 to vector<8x1xf32>
    %35 = arith.maximumf %33, %34 : vector<8x1xf32>
    %36 = math.rsqrt %35 : vector<8x1xf32>
    %37 = vector.broadcast %36 : vector<8x1xf32> to vector<8x128xf32>
    %38 = arith.mulf %30, %37 : vector<8x128xf32>
    %c0_15 = arith.constant 0 : index
    %c0_16 = arith.constant 0 : index
    %39 = vector.load %arg4[%c0_15, %c0_16] : memref<8x128xf32, #tpu.memory_space<vmem>>, vector<8x128xf32>
    tpu.vector_store %arg4[%c0_15, %c0_16], %38 {strides = array<i32>} : memref<8x128xf32, #tpu.memory_space<vmem>>, vector<8x128xf32>,
    return
  }
  func.func @transform_0(%arg0: i32) -> (i32, i32) {
    %c0_i32 = arith.constant 0 : i32
    %c0_i32_0 = arith.constant 0 : i32
    return %arg0, %c0_i32 : i32, i32
  }
  func.func @transform_1(%arg0: i32) -> (i32, i32) {
    %c0_i32 = arith.constant 0 : i32
    %c0_i32_0 = arith.constant 0 : i32
    %c0_i32_1 = arith.constant 0 : i32
    return %c0_i32, %c0_i32_0 : i32, i32
  }
  func.func @transform_2(%arg0: i32) -> (i32, i32) {
    %c0_i32 = arith.constant 0 : i32
    %c0_i32_0 = arith.constant 0 : i32
    %c0_i32_1 = arith.constant 0 : i32
    return %c0_i32, %c0_i32_0 : i32, i32
  }
  func.func @transform_3(%arg0: i32) -> (i32, i32) {
    %c0_i32 = arith.constant 0 : i32
    %c0_i32_0 = arith.constant 0 : i32
    return %arg0, %c0_i32 : i32, i32
  }
}

</mosaic_0001>

<bundles_post_ra>
// kernel: tpu_custom_call.1
= control target key start
LH: loop header
LB: loop body
LE: loop exit
PB: predicated region body
PF: predicated region fallthrough
CT: control target
= control target key end

     0   :  { %8 = vsyncpa [#allocation3], 0  ;;  %s1017_s0 = inlined_call_operand.hbm [shape: f32[16,32], index: 0, kind: input, shape index: {}]   ;;  %s1018_s1 = inlined_call_operand.hbm [shape: bf16[32,128], index: 1, kind: input, shape index: {}]   ;;  %s1019_s2 = inlined_call_operand.hbm [shape: bf16[128,128], index: 2, kind: input, shape index: {}]   ;;  %s1020_s3 = inlined_call_operand.hbm [shape: f32[16,128], index: 3, kind: output, shape index: {}]  }
   0x1   :  { %10 = vsyncpa [#allocation3 + $0x1], 0 }
   0x2   :  { %11 = vsyncpa [#allocation6], 0 }
   0x3   :  { %12 = vsyncpa [#allocation4], 0 }
   0x4   :  { %14 = vsyncpa [#allocation4 + $0x1], 0  ;;  %s845_s12 = smov 0   ;;  %s847_s13 = smov 0  }
   0x5   :  { %s849_s14 = smov 0   ;;  %s851_s15 = smov 0  }
   0x6 LB: > { %s866_s16 = sadd.s32 4294967295, %s815_s15   ;;  %s513_s17 = sadd.s32 4294967294, %s815_s15   ;;  %s815_s15 = sphi %s851_s15, %s1042_s15   ;;  %s811_s14 = sphi %s849_s14, %s1041_s14   ;;  %s807_s13 = sphi %s847_s13, %s1040_s13   ;;  %s803_s12 = sphi %s845_s12, %s1039_s12  }
   0x7   : > { %p40_p0 = scmp.ne.s32.totalorder %s807_s13, %s803_s12  ;;  %p1021_p1 = scmp.eq.s32.totalorder %s866_s16, 0 }
   0x8   : > { %p112_p3 = scmp.eq.s32.totalorder %s513_s17, 1  ;;  %p514_p5 = scmp.ge.s32.totalorder %s815_s15, 1 }
   0x9   : > { %p875_p4 = por %p1021_p1, %p40_p0  ;;  %p119_p7 = scmp.lt.s32.totalorder %s815_s15, 3 }
   0xa   : > { %p880_p6 = por %p112_p3, %p40_p0  ;;  %s817_s21 = smov [#allocation5]  }
   0xb   : > { %s1025_s18 = scalar_select %p875_p4, 1, 0 }
   0xc   : > { %s1026_s19 = scalar_select %p880_p6, 1, 0 }
   0xd   : > { %p885_p8 = pnand %p514_p5, %p119_p7  ;;  %s131_s22 = sshll.u32 %s817_s21, 4  ;;  %s132_s22 = int_to_ptr.vmem [resolvable:$true] %s131_s22 }
   0xe   : > { %s818_s24 = smov [#allocation7]   ;;  %s678_s26 = scalar_lea.vmem %s132_s22, 256 }
   0xf   : > { %s1027_s20 = scalar_select %p885_p8, 1, 0 }
  0x10   : > { %p592_p9 = pneg %p885_p8  ;;  %s144_s25 = sshll.u32 %s818_s24, 4  ;;  %s145_s25 = int_to_ptr.vmem [resolvable:$true] %s144_s25 }
  0x11   : > { %p679_p13 = scmp.ne.s32.totalorder %s132_s22, %s678_s26  ;;  %p686_p5 = scmp.lt.s32.totalorder %s132_s22, %s132_s22 }
  0x12   : > { %p894_p11 = pnand %p592_p9, %p1021_p1  ;;  %p687_p7 = scmp.lt.s32.totalorder %s678_s26, %s678_s26 }
  0x14   : > { %p669_p12 = pneg %p894_p11  ;;  %p688_p10 = por %p687_p7, %p686_p5 }
  0x16   : > { %p681_p0 = pnand %p679_p13, %p669_p12 }
  0x18   : > { %p682_p3 = pneg %p681_p0 }
  0x1a   : > { %p689_p9 = pnand %p688_p10, %p682_p3 }
  0x1c   : > { %692 = shalt.err (!%p689_p9)
}
  0x1d   : > { %s819_s27 = smov 64   ;;  %s820_s28 = smov 4  }
  0x1e   : > { %595 = dma.hbm_to_vmem [thread:$0]  (!%p894_p11), %s1018_s1, 256, %s132_s22, [#allocation6], %s819_s27, %s819_s27, %s820_s28  }
  0x1f   : > { %s704_s4 = scalar_lea.vmem %s145_s25, 1024  ;;  %p712_p2 = scmp.lt.s32.totalorder %s145_s25, %s145_s25 }
  0x20   : > { %p705_p1 = scmp.ne.s32.totalorder %s145_s25, %s704_s4  ;;  %p713_p6 = scmp.lt.s32.totalorder %s704_s4, %s704_s4 }
  0x22   : > { %p707_p13 = pnand %p705_p1, %p669_p12  ;;  %p714_p5 = por %p713_p6, %p712_p2 }
  0x24   : > { %p708_p0 = pneg %p707_p13 }
  0x26   : > { %p715_p10 = pnand %p714_p5, %p708_p0 }
  0x28   : > { %718 = shalt.err (!%p715_p10)
}
  0x29   : > { %598 = dma.hbm_to_vmem [thread:$0]  (!%p894_p11), %s1019_s2, 1024, %s145_s25, [#allocation6], %s819_s27, %s819_s27, %s820_s28  }
  0x2a   : > { %s917_s7 = sadd.s32 1, %s815_s15   ;;  %s27_s8 = sadd.s32 1, %s811_s14 }
  0x2b   : > { %s24_s9 = ssub.s32 %s815_s15, %s917_s7  ;;  %p34_p1 = scmp.ne.s32.totalorder %s811_s14, %s807_s13 }
  0x2c   : > { %p25_p2 = scmp.eq.s32.totalorder %s24_s9, 0  ;;  %p35_p6 = scmp.eq.s32.totalorder %s815_s15, 0 }
  0x2d   : > { %p1029_p12 = scmp.eq.s32.totalorder %s866_s16, 1  ;;  %p609_p7 = scmp.lt.s32.totalorder %s815_s15, 2 }
  0x2e   : > { %s933_s11 = scalar_select %p25_p2, %s811_s14, %s27_s8  }
  0x2f   : > { %p927_p3 = por %p1029_p12, %p34_p1  ;;  %p36_p9 = por %p35_p6, %p34_p1 }
  0x30   : > { %s158_s17 = sand.u32 1, %s811_s14   ;;  %s519_s22 = sshll.u32 %s815_s15, 7 }
  0x31   : > { %s1030_s10 = scalar_select %p927_p3, 1, 0 }
  0x32   : > { %s518_s21 = sshll.u32 %s158_s17, 3  ;;  %s940_s25 = scalar_lea.hbm %s1017_s0, %s519_s22 }
  0x33   : > { %s162_s26 = scalar_lea.vmem [#allocation2], %s518_s21  ;;  %p942_p11 = pnand %p609_p7, %p36_p9 }
  0x34   : > { %s169_s27 = sshll.u32 %s162_s26, 4  ;;  %s159_s29 = scalar_lea.sflag [#allocation3], %s158_s17  ;;  %s170_s27 = int_to_ptr.vmem [resolvable:$true] %s169_s27 }
  0x35   : > { %s719_s30 = scalar_lea.hbm %s940_s25, 128  ;;  %p721_p0 = pneg %p942_p11 }
  0x36   : > { %p720_p13 = scmp.ne.s32.totalorder %s940_s25, %s719_s30  ;;  %s724_s6 = scalar_lea.hbm %s1017_s0, 256 }
  0x37   : > { %p725_p1 = scmp.lt.s32.totalorder %s940_s25, %s1017_s0  ;;  %p726_p2 = scmp.lt.s32.totalorder %s724_s6, %s719_s30 }
  0x38   : > { %p722_p5 = pnand %p721_p0, %p720_p13 }
  0x39   : > { %p727_p6 = por %p726_p2, %p725_p1 }
  0x3a   : > { %p723_p10 = pneg %p722_p5 }
  0x3c   : > { %p728_p12 = pnand %p727_p6, %p723_p10 }
  0x3e   : > { %731 = shalt.err (!%p728_p12)
}
  0x3f   : > { %s732_s21 = scalar_lea.vmem %s170_s27, 128  ;;  %s821_s17 = smov [#allocation2]  }
  0x40   : > { %p733_p7 = scmp.ne.s32.totalorder %s170_s27, %s732_s21  ;;  %s737_s22 = sshll.u32 %s821_s17, 4  ;;  %s738_s22 = int_to_ptr.vmem [resolvable:$false] %s737_s22 }
  0x41   : > { %s739_s23 = scalar_lea.vmem %s738_s22, 256  ;;  %p740_p13 = scmp.lt.s32.totalorder %s170_s27, %s738_s22 }
  0x42   : > { %p735_p9 = pnand %p733_p7, %p721_p0  ;;  %p741_p5 = scmp.lt.s32.totalorder %s739_s23, %s732_s21 }
  0x44   : > { %p736_p3 = pneg %p735_p9  ;;  %p742_p4 = por %p741_p5, %p740_p13 }
  0x46   : > { %p743_p8 = pnand %p742_p4, %p736_p3 }
  0x48   : > { %746 = shalt.err (!%p743_p8)
}
  0x49   : > { %602 = dma.hbm_to_vmem [thread:$0]  (!%p942_p11), %s940_s25, 128, %s170_s27, %s159_s29  }
  0x4a   : > { %p1032_p10 = scmp.ne.s32.totalorder %s1027_s20, 0 }
  0x4b   : > { %s963_s24 = sand.u32 (!%p1032_p10), 1, %s807_s13   ;;  %p1033_p4 = scmp.ne.s32.totalorder (!%p1032_p10), %s1025_s18, 0 }
  0x4c   : > { %178 = sbr.rel (%p1032_p10) target bundleno = 1109 (0x455), region = 32  ;;  %s521_s26 = sshll.u32 (!%p1032_p10), %s963_s24, 3 }
  0x4d   : > { %s181_s30 = scalar_lea.sflag (!%p1032_p10), [#allocation3], %s963_s24  ;;  %s184_s4 = scalar_lea.vmem (!%p1032_p10), [#allocation2], %s521_s26 }
  0x51   : > { %790 = dma.done.wait (%p1033_p4), %s181_s30, 128  }
  0x52   : > { %792 = vsyncadd (%p1033_p4), %s181_s30, 4294967168  ;;  %p1034_p8 = scmp.eq.s32.totalorder %s866_s16, 0 }
  0x54   : > { %794 = dma.done.wait (%p1034_p8), [#allocation6], 1280   ;;  %p1035_p3 = pmov %p1034_p8 }
  0x55   : > { %vm217_vm0 = vcmask 261120   ;;  %v216_v0 = vld [vmem:[%s184_s4] sm:$0xff]  ;;  %v651_v7 = vld [vmem:[#allocation5 + $0x8] sm:$0xff]   ;;  %v822_v8 = vmov 0.0   ;;  %vm823_vm1 = vmmov 0   ;;  %v652_v9 = vld [vmem:[#allocation5] sm:$0xff]  }
  0x56   : > { %796 = vsyncadd (%p1035_p3), [#allocation6], 4294966016  ;;  %v218_v1 = vsel %vm217_vm0, %v216_v0, 0.0  ;;  %552 = vmatprep.subr.bf16.mxu0 %v822_v8  ;;  %556 = vmatprep.mubr.msk.bf16.mxu0 %vm823_vm1, %v822_v8  ;;  %v653_v16 = vld [vmem:[#allocation7 + $0x38] sm:$0xff]   ;;  %v654_v17 = vld [vmem:[#allocation7 + $0x30] sm:$0xff]   ;;  %s537_s18 = sshll.u32 %s866_s16, 7 }
  0x57   : > { %219 = vadd.xlane.f32.xlu0 %v218_v1  ;;  %553 = vmatpush3.bf16.msra.mxu0 %v651_v7  ;;  %v655_v18 = vld [vmem:[#allocation7 + $0x28] sm:$0xff]   ;;  %v656_v24 = vld [vmem:[#allocation7 + $0x20] sm:$0xff]   ;;  %v657_v25 = vld [vmem:[#allocation7 + $0x18] sm:$0xff]   ;;  %s214_s20 = scalar_lea.vmem [#allocation8], %s521_s26  ;;  %s422_s29 = scalar_lea.hbm %s1020_s3, %s537_s18 }
  0x58   : > { %560 = vmatprep.subr.bf16.mxu1 %v822_v8  ;;  %554 = vmatprep.subr.bf16.mxu0 %v822_v8  ;;  %v658_v26 = vld [vmem:[#allocation7 + $0x10] sm:$0xff]   ;;  %v659_v27 = vld [vmem:[#allocation7 + $0x8] sm:$0xff]   ;;  %v660_v28 = vld [vmem:[#allocation7] sm:$0xff]   ;;  %s424_s25 = sshll.u32 %s214_s20, 4  ;;  %s411_s5 = scalar_lea.sflag [#allocation4], %s963_s24  ;;  %s425_s25 = int_to_ptr.vmem [resolvable:$true] %s424_s25 }
  0x59   : > { %576 = vmatprep.mubr.msk.bf16.mxu1 %vm823_vm1, %v822_v8  ;;  %561 = vmatpush3.bf16.msra.mxu1 %v653_v16  ;;  %s747_s6 = scalar_lea.vmem %s425_s25, 128  ;;  %p1036_p0 = scmp.ne.s32.totalorder %s1030_s10, 0 }
  0x5a   : > { %562 = vmatprep.subr.bf16.mxu1 %v822_v8  ;;  %p748_p11 = scmp.ne.s32.totalorder %s425_s25, %s747_s6  ;;  %s824_s8 = smov [#allocation8]  }
  0x5b   : > { %555 = vmatpush3.bf16.msra.mxu0 %v652_v9  ;;  %s751_s9 = sshll.u32 %s824_s8, 4  ;;  %s752_s9 = int_to_ptr.vmem [resolvable:$false] %s751_s9 }
  0x5c   : > { %p749_p1 = pnand %p748_p11, %p1036_p0  ;;  %s753_s16 = scalar_lea.vmem %s752_s9, 256 }
  0x5d   : > { %563 = vmatpush3.bf16.msra.mxu1 %v654_v17  ;;  %p754_p6 = scmp.lt.s32.totalorder %s425_s25, %s752_s9  ;;  %p755_p12 = scmp.lt.s32.totalorder %s753_s16, %s747_s6 }
  0x5e   : > { %564 = vmatprep.subr.bf16.mxu1 %v822_v8  ;;  %p750_p2 = pneg %p749_p1 }
  0x5f   : > { %p756_p7 = por %p755_p12, %p754_p6 }
  0x61   : > { %565 = vmatpush3.bf16.msra.mxu1 %v655_v18  ;;  %p757_p9 = pnand %p756_p7, %p750_p2 }
  0x62   : > { %566 = vmatprep.subr.bf16.mxu1 %v822_v8 }
  0x65   : > { %567 = vmatpush3.bf16.msra.mxu1 %v656_v24 }
  0x66   : > { %568 = vmatprep.subr.bf16.mxu1 %v822_v8 }
  0x69   : > { %569 = vmatpush3.bf16.msra.mxu1 %v657_v25 }
  0x6a   : > { %570 = vmatprep.subr.bf16.mxu1 %v822_v8 }
  0x6d   : > { %571 = vmatpush3.bf16.msra.mxu1 %v658_v26 }
  0x6e   : > { %572 = vmatprep.subr.bf16.mxu1 %v822_v8 }
  0x71   : > { %573 = vmatpush3.bf16.msra.mxu1 %v659_v27 }
  0x72   : > { %574 = vmatprep.subr.bf16.mxu1 %v822_v8 }
  0x75   : > { %575 = vmatpush3.bf16.msra.mxu1 %v660_v28 }
  0xe0   : > { %v220_v2 = vpop.xlane.xlu0 %219 }
  0xe1   : > { %v222_v3 = vmul.f32 0.03125, %v220_v2 }
  0xe3   : > { %v223_v4 = vsub.f32 %v216_v0, %v222_v3 }
  0xe5   : > { %v224_v5 = vmul.f32 %v223_v4, %v223_v4 }
  0xe7   : > { %v225_v6 = vsel %vm217_vm0, %v224_v5, 0.0 }
  0xe8   : > { %226 = vadd.xlane.f32.xlu0 %v225_v6 }
 0x171   : > { %v227_v10 = vpop.xlane.xlu0 %226 }
 0x172   : > { %v228_v11 = vmul.f32 0.03125, %v227_v10 }
 0x174   : > { %v229_v12 = vadd.f32 1e-05, %v228_v11 }
 0x176   : > { %661 = vrsqrt.f32 %v229_v12 }
 0x183   : > { %v662_v13 = vpop.eup %661 }
 0x184   : > { %v231_v14 = vmul.f32 %v662_v13, %v223_v4 }
 0x186   : > { %v232_v15 = vpack.c.bf16 %v231_v14, %v231_v14 }
 0x188   : > { %557 = vmatmul.mubr.msk.bf16.vlgmr.msra.gmra.mxu0 %vm217_vm0, %v232_v15 }
 0x248   : > { %v286_v19 = vpop.f32.mrf.mxu0 }
 0x249   : > { %v292_v20 = vmul.f32 %v286_v19, %v286_v19 }
 0x24a   : > { %v558_v21 = vpop.f32.mrf.mxu0 }
 0x24b   : > { %293 = vadd.xlane.f32.xlu1 %v292_v20 }
 0x24c   : > { %v289_v22 = vpop.f32.mrf.mxu0 }
 0x24e   : > { %v559_v23 = vpop.f32.mrf.mxu0 }
 0x2d4   : > { %v294_v29 = vpop.xlane.xlu1 %293 }
 0x2d5   : > { %v295_v30 = vmax.f32 %v294_v29, 1e-24 }
 0x2d7   : > { %663 = vrsqrt.f32 %v295_v30 }
 0x2e4   : > { %v664_v31 = vpop.eup %663 }
 0x2e5   : > { %v297_v32 = vmul.f32 %v664_v31, %v286_v19 }
 0x2e7   : > { %v298_v33 = vpack.c.bf16 %v297_v32, %v297_v32 }
 0x2e9   : > { %577 = vmatmul.mubr.bf16.vlgmr.msra.gmra.mxu1 %v298_v33 }
 0x3a9   : > { %v397_v34 = vpop.f32.mrf.mxu1 }
 0x3aa   : > { %v403_v35 = vmul.f32 %v397_v34, %v397_v34 }
 0x3ab   : > { %v578_v36 = vpop.f32.mrf.mxu1 }
 0x3ac   : > { %404 = vadd.xlane.f32.xlu1 %v403_v35 }
 0x3ad   : > { %v400_v37 = vpop.f32.mrf.mxu1 }
 0x3af   : > { %v579_v38 = vpop.f32.mrf.mxu1 }
 0x435   : > { %v405_v39 = vpop.xlane.xlu1 %404 }
 0x436   : > { %v406_v40 = vmax.f32 %v405_v39, 1e-24 }
 0x438   : > { %665 = vrsqrt.f32 %v406_v40 }
 0x445   : > { %v666_v41 = vpop.eup %665 }
 0x446   : > { %v408_v42 = vmul.f32 %v666_v41, %v397_v34 }
 0x448   : > { %409 = vst [vmem:[%s214_s20] sm:$0xff] %v408_v42 }
 0x449   : > { %760 = shalt.err (!%p757_p9)
}
 0x44a   : > { %s761_s21 = scalar_lea.hbm %s422_s29, 128  ;;  %s765_s23 = scalar_lea.hbm %s1020_s3, 256 }
 0x44b   : > { %p762_p13 = scmp.ne.s32.totalorder %s422_s29, %s761_s21  ;;  %p766_p4 = scmp.lt.s32.totalorder %s422_s29, %s1020_s3 }
 0x44c   : > { %p767_p8 = scmp.lt.s32.totalorder %s765_s23, %s761_s21 }
 0x44d   : > { %p763_p5 = pnand %p762_p13, %p1036_p0 }
 0x44e   : > { %p768_p3 = por %p767_p8, %p766_p4 }
 0x44f   : > { %p764_p10 = pneg %p763_p5 }
 0x451   : > { %p769_p11 = pnand %p768_p3, %p764_p10 }
 0x453   : > { %772 = shalt.err (!%p769_p11)
}
 0x454   : > { %590 = dma.vmem_to_hbm [thread:$0]  (%p1036_p0), %s425_s25, 128, %s422_s29, %s411_s5  }
 0x455 PF: > { %s436_s30 = sand.u32 1, %s803_s12   ;;  %p1037_p1 = scmp.ne.s32.totalorder %s1026_s19, 0 }
 0x456   : > { %p1038_p2 = scmp.ge.s32.totalorder %s815_s15, 2  ;;  %s437_s4 = scalar_lea.sflag [#allocation4], %s436_s30 }
 0x458   : > { %p604_p6 = pnand %p1038_p2, %p1037_p1 }
 0x45a   : > { %p605_p12 = pneg %p604_p6 }
 0x45c   : > { %798 = dma.done.wait (%p605_p12), %s437_s4, 128  }
 0x45d   : > { %800 = vsyncadd (%p605_p12), %s437_s4, 4294967168  ;;  %p17_p7 = scmp.ge.s32.totalorder %s917_s7, 4   ;;  %s1039_s12 = smov %s807_s13 }
 0x45e   : > { %s1040_s13 = smov %s811_s14  ;;  %s1041_s14 = smov %s933_s11 }
 0x45f   : > { %s1042_s15 = smov %s917_s7  ;;  %19 = sbr.rel (!%p17_p7) target bundleno = 6 (0x6), region = 85 }
 0x464   :  { %442 = vsyncpa [#allocation3], 1 }
 0x465   :  { %444 = vsyncpa [#allocation3 + $0x1], 1 }
 0x466   :  { %445 = vsyncpa [#allocation6], 1 }
 0x467   :  { %446 = vsyncpa [#allocation4], 1 }
 0x468   :  { %448 = vsyncpa [#allocation4 + $0x1], 1 }

</bundles_post_ra>
